<compile_context>
chip_gen: v7x
topology: tpu7x:2x2x1
jax: 0.10.0
libtpu: 0.0.40
codegen_flags: <defaults>
</compile_context>

<pallas_src>
import functools

import jax
import jax.numpy as jnp
from jax import lax
from jax.experimental import pallas as pl
from jax.experimental.pallas import tpu as pltpu


def _round_up(x, m):
    return ((x + m - 1) // m) * m


def _to_i32(v):
    """Python int -> two's-complement int32 (for SMEM scalar operands)."""
    v = int(v) & 0xFFFFFFFF
    return v - (1 << 32) if v >= (1 << 31) else v


def _pick_row_block(oh, ow, target_m=256):
    """Rows of output processed per grid step (keeps in-kernel reshapes
    layout-preserving: bh > 1 only when OW is a multiple of 8)."""
    if ow % 8 != 0:
        return 1
    best = 1
    for bh in range(1, oh + 1):
        if oh % bh == 0 and bh * ow <= target_m:
            best = bh
    return best


def _pick_cout_tile(np_pad):
    """Largest nice divisor of the (128-multiple) padded Cout."""
    for tn in (512, 256, 128):
        if tn <= np_pad and np_pad % tn == 0:
            return tn
    return np_pad


# ----------------------------------------------------------------------------
# Kernel: fused (space-to-depth conv as 2x2/stride-1 window GEMM) + dropout
# ----------------------------------------------------------------------------
def _enc_conv_dropout_kernel(params_ref, top_ref, bot_ref, w_ref, o_ref, *,
                             bh, ow, c4, tn, oh_total, ow_total, np_total,
                             training, rate):
    # top_ref / bot_ref : (1, bh, OW+1, C4)   (bot is the dh=+1 shifted view)
    # w_ref             : (4*C4, tn)
    # o_ref             : (1, bh, OW, tn)
    m = bh * ow

    # The four 2x2 taps are column shifts of the two row-shifted views.
    t00 = top_ref[0, :, 0:ow, :]
    t01 = top_ref[0, :, 1:ow + 1, :]
    t10 = bot_ref[0, :, 0:ow, :]
    t11 = bot_ref[0, :, 1:ow + 1, :]

    y = None
    for t, a in enumerate((t00, t01, t10, t11)):
        contrib = jnp.dot(a.reshape(m, c4),
                          w_ref[t * c4:(t + 1) * c4, :],
                          preferred_element_type=jnp.float32)
        y = contrib if y is None else y + contrib          # (m, tn) f32

    if training and rate > 0.0:
        if rate >= 1.0:
            y = jnp.zeros_like(y)                          # guard 1/(1-rate)=inf
        else:
            n_id = pl.program_id(0)
            ob_id = pl.program_id(1)
            j_id = pl.program_id(2)
            seed_u = params_ref[0].astype(jnp.uint32)
            thresh_u = params_ref[1].astype(jnp.uint32)

            row = lax.broadcasted_iota(jnp.int32, (m, tn), 0)
            col = lax.broadcasted_iota(jnp.int32, (m, tn), 1)
            base = (n_id * oh_total + ob_id * bh) * ow_total
            gid = ((base + row).astype(jnp.uint32) * jnp.uint32(np_total)
                   + (j_id * tn + col).astype(jnp.uint32))

            # lowbias32-style integer mixer (VPU-only: xor/shift/mul).
            x = gid ^ seed_u
            x = x ^ (x >> 16)
            x = x * jnp.uint32(0x7FEB352D)
            x = x ^ (x >> 15)
            x = x * jnp.uint32(0x846CA68B)
            x = x ^ (x >> 16)
            keep = x >= thresh_u                           # P(keep) = 1 - rate
            y = jnp.where(keep, y * jnp.float32(1.0 / (1.0 - rate)),
                          jnp.float32(0.0))

    o_ref[...] = y.reshape(o_ref.shape).astype(o_ref.dtype)


# ----------------------------------------------------------------------------
# Wrappers
# ----------------------------------------------------------------------------
def encoder_forward_nhwc(x_nhwc, weight_oihw, *, training=False, drop_rate=0.5,
                         seed=0, kernel_size=4, stride=2, padding=1,
                         compute_dtype=None):
    """Encoder forward on NHWC activations (preferred: no layout plumbing
    when stacking Encoder blocks)."""
    assert kernel_size == 4 and stride == 2 and padding == 1, (
        "this Pallas kernel implements the Encoder default conv config")
    N, H, W, Cin = x_nhwc.shape
    assert H % 2 == 0 and W % 2 == 0, "H and W must be even"
    Cout = weight_oihw.shape[0]

    OH = (H + 2 * padding - kernel_size) // stride + 1
    OW = (W + 2 * padding - kernel_size) // stride + 1
    HB, WB = OH + 1, OW + 1          # == (H + 2p)//2, (W + 2p)//2
    C4 = 4 * Cin
    Kdim = 4 * C4                    # == 16 * Cin

    # Space-to-depth on the padded (1x-sized) input: the 4x4/stride-2 conv
    # becomes a 2x2/stride-1 conv over (N, HB, WB, 4*Cin).
    xp = jnp.pad(x_nhwc, ((0, 0), (padding, padding), (padding, padding), (0, 0)))
    y4 = xp.reshape(N, HB, 2, WB, 2, Cin).transpose(0, 1, 3, 2, 4, 5)
    y4 = y4.reshape(N, HB, WB, C4)

    # Weight -> (Kdim, Cout) in the in-kernel tap order (dh, dw, ph, pw, cin).
    w = jnp.transpose(weight_oihw, (2, 3, 1, 0))           # (KH, KW, Cin, Cout)
    w = w.reshape(2, 2, 2, 2, Cin, Cout)                   # (dh, ph, dw, pw, ..)
    w = jnp.transpose(w, (0, 2, 1, 3, 4, 5))               # (dh, dw, ph, pw, ..)
    w2d = w.reshape(Kdim, Cout)

    Np = _round_up(Cout, 128)        # minimal lane-dense output padding
    w2d = jnp.pad(w2d, ((0, 0), (0, Np - Cout)))

    if compute_dtype is not None:    # optional bf16 MXU path (v6e / v7x)
        y4 = y4.astype(compute_dtype)
        w2d = w2d.astype(compute_dtype)
    y4_dn = y4[:, 1:, :, :]          # row-shifted view for the dh = 1 taps

    bh = _pick_row_block(OH, OW)
    tn = _pick_cout_tile(Np)
    grid = (N, OH // bh, Np // tn)

    out_dtype = x_nhwc.dtype
    rate = float(drop_rate)
    thresh = min(int(round(rate * 4294967296.0)), 4294967295) if rate > 0.0 else 0
    params = jnp.array([_to_i32(seed), _to_i32(thresh)], dtype=jnp.int32)

    kernel = functools.partial(
        _enc_conv_dropout_kernel,
        bh=bh, ow=OW, c4=C4, tn=tn,
        oh_total=OH, ow_total=OW, np_total=Np,
        training=bool(training), rate=rate)

    flops = 2 * N * OH * OW * Kdim * Np
    bytes_accessed = int(y4.size * y4.dtype.itemsize
                         + y4_dn.size * y4_dn.dtype.itemsize
                         + w2d.size * w2d.dtype.itemsize * grid[0] * grid[1]
                         + N * OH * OW * Np * jnp.dtype(out_dtype).itemsize)

    out = pl.pallas_call(
        kernel,
        out_shape=jax.ShapeDtypeStruct((N, OH, OW, Np), out_dtype),
        grid_spec=pltpu.PrefetchScalarGridSpec(
            num_scalar_prefetch=1,
            grid=grid,
            in_specs=[
                pl.BlockSpec((1, bh, WB, C4), lambda n, ob, j, prm: (n, ob, 0, 0)),
                pl.BlockSpec((1, bh, WB, C4), lambda n, ob, j, prm: (n, ob, 0, 0)),
                pl.BlockSpec((Kdim, tn), lambda n, ob, j, prm: (0, j)),
            ],
            out_specs=pl.BlockSpec((1, bh, OW, tn),
                                   lambda n, ob, j, prm: (n, ob, 0, j)),
        ),
        compiler_params=pltpu.CompilerParams(
            dimension_semantics=("parallel", "parallel", "parallel"),
            vmem_limit_bytes=48 * 1024 * 1024,
        ),
        cost_estimate=pl.CostEstimate(
            flops=flops, transcendentals=0, bytes_accessed=bytes_accessed),
    )(params, y4, y4_dn, w2d)

    return out[..., :Cout]


def encoder_forward(x_nchw, weight_oihw, *, training=False, drop_rate=0.5,
                    seed=0, compute_dtype=None):
    """PyTorch-convention NCHW interface (transposes only at the boundary)."""
    x_nhwc = jnp.transpose(x_nchw, (0, 2, 3, 1))
    y = encoder_forward_nhwc(x_nhwc, weight_oihw, training=training,
                             drop_rate=drop_rate, seed=seed,
                             compute_dtype=compute_dtype)
    return jnp.transpose(y, (0, 3, 1, 2))


# ----------------------------------------------------------------------------
# Main
# ----------------------------------------------------------------------------
if __name__ == "__main__":
    key = jax.random.PRNGKey(0)
    k_x, k_w = jax.random.split(key)

    N, Cin, H, W = 2, 4, 16, 16
    Cout, K = 8, 4

    x = jax.random.normal(k_x, (N, Cin, H, W), dtype=jnp.float32)
    fan_in = Cin * K * K
    weight = (jax.random.normal(k_w, (Cout, Cin, K, K), dtype=jnp.float32)
              / jnp.sqrt(fan_in))

    # Eval-mode forward (Dropout is identity), i.e. model.eval() semantics.
    out = jax.block_until_ready(encoder_forward(x, weight, training=False))

    ref = lax.conv_general_dilated(
        x, weight, window_strides=(2, 2), padding=[(1, 1), (1, 1)],
        dimension_numbers=("NCHW", "OIHW", "NCHW"))
    assert out.shape == (N, Cout, H // 2, W // 2), out.shape
    assert jnp.allclose(out, ref, atol=1e-4, rtol=1e-4), "mismatch vs reference conv"

    # Training-mode forward: fused inverted dropout (p = 0.5).
    out_train = jax.block_until_ready(
        encoder_forward(x, weight, training=True, seed=42))
    assert out_train.shape == out.shape

    kept = out_train != 0
    assert jnp.allclose(jnp.where(kept, out_train, 0.0),
                        jnp.where(kept, 2.0 * ref, 0.0),
                        atol=1e-4, rtol=1e-4), "dropout scaling mismatch"
    drop_frac = float(1.0 - jnp.mean(kept.astype(jnp.float32)))
    assert 0.3 < drop_frac < 0.7, f"unexpected drop fraction {drop_frac}"

    # Different seed (dynamic SMEM scalar) -> different mask, same kernel.
    out_train2 = jax.block_until_ready(
        encoder_forward(x, weight, training=True, seed=7))
    assert bool(jnp.any((out_train2 != 0) != kept)), "mask did not change with seed"

    print("KERNEL_OK")
</pallas_src>

<mosaic_0001>
module attributes {stable_mosaic.version = 11 : i64} {
  func.func @_enc_conv_dropout_kernel(%arg0: i32, %arg1: i32, %arg2: i32, %arg3: memref<2xi32, #tpu.memory_space<smem>>, %arg4: memref<1x8x9x16xf32, #tpu.memory_space<vmem>>, %arg5: memref<1x8x9x16xf32, #tpu.memory_space<vmem>>, %arg6: memref<64x128xf32, #tpu.memory_space<vmem>>, %arg7: memref<1x8x8x128xf32, #tpu.memory_space<vmem>>) attributes {dimension_semantics = [#tpu.dimension_semantics<parallel>, #tpu.dimension_semantics<parallel>, #tpu.dimension_semantics<parallel>], iteration_bounds = array<i64: 2, 1, 1>, scalar_prefetch = 1 : i64, scratch_operands = 0 : i64, tpu.core_type = #tpu.core_type<tc>, window_params = [{transform_indices = @transform_0, window_bounds = array<i64: 1, 8, 9, 16>}, {transform_indices = @transform_1, window_bounds = array<i64: 1, 8, 9, 16>}, {transform_indices = @transform_2, window_bounds = array<i64: 64, 128>}, {transform_indices = @transform_3, window_bounds = array<i64: 1, 8, 8, 128>}]} {
    %c0 = arith.constant 0 : index
    %c0_0 = arith.constant 0 : index
    %c0_1 = arith.constant 0 : index
    %c0_2 = arith.constant 0 : index
    %0 = vector.load %arg4[%c0, %c0_0, %c0_1, %c0_2] : memref<1x8x9x16xf32, #tpu.memory_space<vmem>>, vector<1x8x8x16xf32>
    %1 = vector.shape_cast %0 : vector<1x8x8x16xf32> to vector<8x8x16xf32>
    %c0_3 = arith.constant 0 : index
    %c0_4 = arith.constant 0 : index
    %c1 = arith.constant 1 : index
    %c0_5 = arith.constant 0 : index
    %2 = vector.load %arg4[%c0_3, %c0_4, %c1, %c0_5] : memref<1x8x9x16xf32, #tpu.memory_space<vmem>>, vector<1x8x8x16xf32>
    %3 = vector.shape_cast %2 : vector<1x8x8x16xf32> to vector<8x8x16xf32>
    %c0_6 = arith.constant 0 : index
    %c0_7 = arith.constant 0 : index
    %c0_8 = arith.constant 0 : index
    %c0_9 = arith.constant 0 : index
    %4 = vector.load %arg5[%c0_6, %c0_7, %c0_8, %c0_9] : memref<1x8x9x16xf32, #tpu.memory_space<vmem>>, vector<1x8x8x16xf32>
    %5 = vector.shape_cast %4 : vector<1x8x8x16xf32> to vector<8x8x16xf32>
    %c0_10 = arith.constant 0 : index
    %c0_11 = arith.constant 0 : index
    %c1_12 = arith.constant 1 : index
    %c0_13 = arith.constant 0 : index
    %6 = vector.load %arg5[%c0_10, %c0_11, %c1_12, %c0_13] : memref<1x8x9x16xf32, #tpu.memory_space<vmem>>, vector<1x8x8x16xf32>
    %7 = vector.shape_cast %6 : vector<1x8x8x16xf32> to vector<8x8x16xf32>
    %8 = vector.shape_cast %1 : vector<8x8x16xf32> to vector<64x16xf32>
    %c0_14 = arith.constant 0 : index
    %c0_15 = arith.constant 0 : index
    %9 = vector.load %arg6[%c0_14, %c0_15] : memref<64x128xf32, #tpu.memory_space<vmem>>, vector<16x128xf32>
    %cst = arith.constant dense<0.000000e+00> : vector<64x128xf32>
    %10 = tpu.matmul %8, %9, %cst {dimension_numbers = #tpu.dot_dimension_numbers<[1], [0], [0], [1], [0, 0, 1, 1], [], []>} : vector<64x16xf32>, vector<16x128xf32>, vector<64x128xf32> -> vector<64x128xf32>
    %11 = vector.shape_cast %3 : vector<8x8x16xf32> to vector<64x16xf32>
    %c16 = arith.constant 16 : index
    %c0_16 = arith.constant 0 : index
    %12 = vector.load %arg6[%c16, %c0_16] : memref<64x128xf32, #tpu.memory_space<vmem>>, vector<16x128xf32>
    %cst_17 = arith.constant dense<0.000000e+00> : vector<64x128xf32>
    %13 = tpu.matmul %11, %12, %cst_17 {dimension_numbers = #tpu.dot_dimension_numbers<[1], [0], [0], [1], [0, 0, 1, 1], [], []>} : vector<64x16xf32>, vector<16x128xf32>, vector<64x128xf32> -> vector<64x128xf32>
    %14 = arith.addf %10, %13 : vector<64x128xf32>
    %15 = vector.shape_cast %5 : vector<8x8x16xf32> to vector<64x16xf32>
    %c32 = arith.constant 32 : index
    %c0_18 = arith.constant 0 : index
    %16 = vector.load %arg6[%c32, %c0_18] : memref<64x128xf32, #tpu.memory_space<vmem>>, vector<16x128xf32>
    %cst_19 = arith.constant dense<0.000000e+00> : vector<64x128xf32>
    %17 = tpu.matmul %15, %16, %cst_19 {dimension_numbers = #tpu.dot_dimension_numbers<[1], [0], [0], [1], [0, 0, 1, 1], [], []>} : vector<64x16xf32>, vector<16x128xf32>, vector<64x128xf32> -> vector<64x128xf32>
    %18 = arith.addf %14, %17 : vector<64x128xf32>
    %19 = vector.shape_cast %7 : vector<8x8x16xf32> to vector<64x16xf32>
    %c48 = arith.constant 48 : index
    %c0_20 = arith.constant 0 : index
    %20 = vector.load %arg6[%c48, %c0_20] : memref<64x128xf32, #tpu.memory_space<vmem>>, vector<16x128xf32>
    %cst_21 = arith.constant dense<0.000000e+00> : vector<64x128xf32>
    %21 = tpu.matmul %19, %20, %cst_21 {dimension_numbers = #tpu.dot_dimension_numbers<[1], [0], [0], [1], [0, 0, 1, 1], [], []>} : vector<64x16xf32>, vector<16x128xf32>, vector<64x128xf32> -> vector<64x128xf32>
    %22 = arith.addf %18, %21 : vector<64x128xf32>
    %23 = vector.shape_cast %22 : vector<64x128xf32> to vector<1x8x8x128xf32>
    %c0_22 = arith.constant 0 : index
    %c0_23 = arith.constant 0 : index
    %c0_24 = arith.constant 0 : index
    %c0_25 = arith.constant 0 : index
    %24 = vector.load %arg7[%c0_22, %c0_23, %c0_24, %c0_25] : memref<1x8x8x128xf32, #tpu.memory_space<vmem>>, vector<1x8x8x128xf32>
    tpu.vector_store %arg7[%c0_22, %c0_23, %c0_24, %c0_25], %23 {strides = array<i32>} : memref<1x8x8x128xf32, #tpu.memory_space<vmem>>, vector<1x8x8x128xf32>,
    return
  }
  func.func @transform_0(%arg0: i32, %arg1: i32, %arg2: i32, %arg3: memref<2xi32, #tpu.memory_space<smem>>) -> (i32, i32, i32, i32) {
    %c0_i32 = arith.constant 0 : i32
    %c0_i32_0 = arith.constant 0 : i32
    %c0_i32_1 = arith.constant 0 : i32
    return %arg0, %arg1, %c0_i32, %c0_i32_0 : i32, i32, i32, i32
  }
  func.func @transform_1(%arg0: i32, %arg1: i32, %arg2: i32, %arg3: memref<2xi32, #tpu.memory_space<smem>>) -> (i32, i32, i32, i32) {
    %c0_i32 = arith.constant 0 : i32
    %c0_i32_0 = arith.constant 0 : i32
    %c0_i32_1 = arith.constant 0 : i32
    return %arg0, %arg1, %c0_i32, %c0_i32_0 : i32, i32, i32, i32
  }
  func.func @transform_2(%arg0: i32, %arg1: i32, %arg2: i32, %arg3: memref<2xi32, #tpu.memory_space<smem>>) -> (i32, i32) {
    %c0_i32 = arith.constant 0 : i32
    %c0_i32_0 = arith.constant 0 : i32
    return %c0_i32, %arg2 : i32, i32
  }
  func.func @transform_3(%arg0: i32, %arg1: i32, %arg2: i32, %arg3: memref<2xi32, #tpu.memory_space<smem>>) -> (i32, i32, i32, i32) {
    %c0_i32 = arith.constant 0 : i32
    %c0_i32_0 = arith.constant 0 : i32
    return %arg0, %arg1, %c0_i32, %arg2 : i32, i32, i32, i32
  }
}

</mosaic_0001>

<bundles_post_ra>
// kernel: tpu_custom_call.1
= control target key start
LH: loop header
LB: loop body
LE: loop exit
PB: predicated region body
PF: predicated region fallthrough
CT: control target
= control target key end

     0   :  { %s1612_s0 = inlined_call_operand.vmem [shape: s32[2], index: 0, kind: input, shape index: {}]   ;;  %s1613_s1 = inlined_call_operand.vmem [shape: f32[2,9,9,16], index: 1, kind: input, shape index: {}]   ;;  %s1614_s2 = inlined_call_operand.vmem [shape: f32[2,8,9,16], index: 2, kind: input, shape index: {}]   ;;  %s1615_s3 = inlined_call_operand.vmem [shape: f32[64,128], index: 3, kind: input, shape index: {}]   ;;  %s1616_s4 = inlined_call_operand.hbm [shape: f32[2,8,8,128], index: 4, kind: output, shape index: {}]  }
   0x1   :  { %s9_s17 = sshll.u32 %s1612_s0, 4  ;;  %s10_s17 = int_to_ptr.vmem [resolvable:$true] %s9_s17 }
   0x2   :  { %s1272_s18 = scalar_lea.vmem %s10_s17, 16  ;;  %p1277_p1 = scmp.lt.s32.totalorder %s10_s17, %s10_s17 }
   0x3   :  { %p1273_p0 = scmp.ne.s32.totalorder %s10_s17, %s1272_s18  ;;  %p1278_p2 = scmp.lt.s32.totalorder %s1272_s18, %s1272_s18 }
   0x5   :  { %p1279_p3 = por %p1278_p2, %p1277_p1 }
   0x7   :  { %p1280_p4 = pnand %p1279_p3, %p1273_p0 }
   0x9   :  { %1283 = shalt.err (!%p1280_p4)  }
   0xa   :  { %s1366_s19 = smov [#allocation3]  }
   0xb   :  { %12 = dma.vmem_to_smem %s10_s17, 16, %s1366_s19, [#allocation2] }
   0xc   :  { %1336 = dma.done.wait [#allocation2], 16 }
   0xd   :  { %1337 = vsyncadd [#allocation2], 4294967280 }
   0xe   :  { %14 = sfence }
   0xf   :  { %15 = vsyncpa [#allocation5], 0 }
  0x10   :  { %17 = vsyncpa [#allocation5 + $0x1], 0  ;;  %s1398_s20 = smov 0   ;;  %s1400_s21 = smov 0  }
  0x11   :  { %s1402_s0 = smov 0   ;;  %s1404_s22 = smov 0  }
  0x12   :  { %s1406_s23 = smov 0   ;;  %s1408_s24 = smov 0  }
  0x13 LB: > { %s1020_s25 = sadd.s32 4294967295, %s1364_s24   ;;  %s1021_s26 = sadd.s32 4294967294, %s1364_s24   ;;  %s1364_s24 = sphi %s1408_s24, %s23_s24   ;;  %s1360_s23 = sphi %s1406_s23, %s1623_s23   ;;  %s1356_s22 = sphi %s1404_s22, %s1622_s22   ;;  %s1352_s0 = sphi %s1402_s0, %s1621_s0   ;;  %s1348_s21 = sphi %s1400_s21, %s1620_s21   ;;  %s1344_s20 = sphi %s1398_s20, %s1619_s20  }
  0x14   : > { %s42_s27 = sadd.s32 1, %s1360_s23  ;;  %s135_s28 = sadd.s32 1, %s1352_s0 }
  0x15   : > { %p44_p5 = scmp.ge.s32.totalorder %s42_s27, 2  ;;  %p145_p6 = scmp.ne.s32.totalorder %s1352_s0, %s1348_s21 }
  0x16   : > { %p146_p7 = scmp.eq.s32.totalorder %s1020_s25, 1  ;;  %p151_p8 = scmp.ne.s32.totalorder %s1348_s21, %s1344_s20 }
  0x17   : > { %s1625_s27 = smov (%p44_p5, %s42_s27), 0  ;;  %p152_p10 = scmp.eq.s32.totalorder %s1021_s26, 1 }
  0x18   : > { %p1438_p9 = por %p146_p7, %p145_p6  ;;  %s128_s30 = ssub.s32 %s1360_s23, %s1625_s27 }
  0x19   : > { %p1025_p11 = scmp.ge.s32.totalorder %s1364_s24, 1  ;;  %p133_p12 = scmp.eq.s32.totalorder %s128_s30, 0 }
  0x1a   : > { %p1445_p13 = por %p152_p10, %p151_p8  ;;  %p215_p0 = scmp.lt.s32.totalorder %s1364_s24, 3 }
  0x1b   : > { %s1451_s6 = scalar_select %p133_p12, %s1352_s0, %s135_s28  }
  0x1c   : > { %p216_p1 = pnand %p1025_p11, %p215_p0 }
  0x1d   : > { %v334_v0 = vld [vmem:[%s1615_s3 + $0x10] sm:$0xff] (!%p216_p1)  ;;  %v335_v1 = vld [vmem:[%s1615_s3 + $0x18] sm:$0xff] (!%p216_p1)  ;;  %v595_v2 = vld [vmem:[%s1615_s3 + $0x20] sm:$0xff] (!%p216_p1)  ;;  %p269_p2 = scmp.lt.s32.totalorder (!%p216_p1), %s1356_s22, 1  ;;  %vm336_vm0 = vcmask (!%p216_p1), 130048   ;;  %s260_s15 = sand.u32 (!%p216_p1), 1, %s1348_s21  }
  0x1e   : > { %219 = sbr.rel (%p216_p1) target bundleno = 302 (0x12e), region = 32  ;;  %v1173_v3 = vpack.c.bf16 (!%p216_p1), %v335_v1, %v334_v0  ;;  %v596_v4 = vld [vmem:[%s1615_s3 + $0x28] sm:$0xff] (!%p216_p1)  ;;  %v332_v5 = vld [vmem:[%s1615_s3] sm:$0xff] (!%p216_p1)  ;;  %v734_v9 = vld [vmem:[%s1615_s3 + $0x30] sm:$0xff] (!%p216_p1)  ;;  %s1026_s16 = sshll.u32 (!%p216_p1), %s260_s15, 6 }
  0x1f   : > { %v333_v6 = vld [vmem:[%s1615_s3 + $0x8] sm:$0xff] (!%p216_p1)  ;;  %v1181_v7 = vpack.c.bf16 (!%p216_p1), %v596_v4, %v595_v2  ;;  %v735_v10 = vld [vmem:[%s1615_s3 + $0x38] sm:$0xff] (!%p216_p1)  ;;  %s262_s17 = scalar_lea.vmem (!%p216_p1), [#allocation4], %s1026_s16  ;;  %s1068_s18 = sshll.u32 (!%p216_p1), %s1356_s22, 10 }
  0x20   : > { %v1177_v8 = vpack.c.bf16 (!%p216_p1), %v333_v6, %v332_v5  ;;  %1174 = vmatprep.subr.bf16.mxu1 (!%p216_p1), %v1173_v3  ;;  %v1185_v11 = vpack.c.bf16 (!%p216_p1), %v735_v10, %v734_v9  ;;  %s1560_s28 = scalar_lea.hbm (!%p216_p1), %s1616_s4, %s1068_s18 }
  0x21   : > { %1182 = vmatprep.subr.bf16.mxu0 (!%p216_p1), %v1181_v7  ;;  %1176 = vmatpush3.bf16.msra.mxu1 (!%p216_p1), %v1173_v3 }
  0x22   : > { %1184 = vmatpush3.bf16.msra.mxu0 (!%p216_p1), %v1181_v7  ;;  %1178 = vmatprep.subr.bf16.mxu1 (!%p216_p1), %v1177_v8 }
  0x23   : > { %1186 = vmatprep.subr.bf16.mxu0 (!%p216_p1), %v1185_v11 }
  0x25   : > { %s270_s19 = scalar_select %p269_p2, %s1356_s22, 1 }
  0x26   : > { %s1566_s22 = scalar_lea.sflag [#allocation5], %s260_s15 }
  0x27   : > { %s1067_s7 = sshll.u32 %s270_s19, 7  ;;  %s1213_s8 = smul.u32 144, %s270_s19 }
  0x28   : > { %s1482_s11 = scalar_lea.vmem %s1614_s2, %s1067_s7  ;;  %s898_s19 = sshll.u32 %s262_s17, 4  ;;  %s1562_s19 = int_to_ptr.vmem [resolvable:$true] %s898_s19 }
  0x29   : > { %v316_v12 = vld [vmem:[%s1482_s11] sm:$0xff]  ;;  %s1488_s14 = scalar_lea.vmem %s1613_s1, %s1213_s8  ;;  %v317_v13 = vld [vmem:[%s1482_s11 + $0x10] sm:$0xff]  ;;  %s1284_s30 = scalar_lea.vmem %s1562_s19, 1024 }
  0x2a   : > { %1145 = vmatprep.mubr.msk.f32.mxu0 %vm336_vm0, %v316_v12  ;;  %v308_v14 = vld [vmem:[%s1488_s14 + $0x1] sm:$0xff]  ;;  %v309_v15 = vld [vmem:[%s1488_s14 + $0x11] sm:$0xff]  ;;  %p1285_p3 = scmp.ne.s32.totalorder %s1562_s19, %s1284_s30  ;;  %s1367_s7 = smov [#allocation4]  }
  0x2b   : > { %v318_v16 = vld [vmem:[%s1482_s11 + $0x20] sm:$0xff]  ;;  %1113 = vmatprep.mubr.msk.f32.mxu1 %vm336_vm0, %v308_v14  ;;  %1146 = vmatmul.mubr.msk.f32.vlgmr.msra.gmra.mrb[0].mxu0 %vm336_vm0, %v317_v13  ;;  %v319_v18 = vld [vmem:[%s1482_s11 + $0x30] sm:$0xff]  ;;  %s1288_s8 = sshll.u32 %s1367_s7, 4  ;;  %s1289_s8 = int_to_ptr.vmem [resolvable:$false] %s1288_s8 }
  0x2c   : > { %v310_v17 = vld [vmem:[%s1488_s14 + $0x21] sm:$0xff]  ;;  %1114 = vmatmul.mubr.msk.f32.vlgmr.msra.gmra.mrb[0].mxu1 %vm336_vm0, %v309_v15  ;;  %1188 = vmatpush3.bf16.msra.mxu0 %v1185_v11  ;;  %v311_v19 = vld [vmem:[%s1488_s14 + $0x31] sm:$0xff]  ;;  %p1286_p4 = pnand %p1285_p3, %p1438_p9  ;;  %s1290_s9 = scalar_lea.vmem %s1289_s8, 2048 }
  0x2d   : > { %1180 = vmatpush3.bf16.msra.mxu1 %v1177_v8  ;;  %1148 = vmatprep.mubr.msk.f32.mxu0 %vm336_vm0, %v318_v16  ;;  %v320_v20 = vld [vmem:[%s1482_s11 + $0x40] sm:$0xff]  ;;  %v321_v22 = vld [vmem:[%s1482_s11 + $0x50] sm:$0xff]  ;;  %p1291_p6 = scmp.lt.s32.totalorder %s1562_s19, %s1289_s8  ;;  %p1292_p7 = scmp.lt.s32.totalorder %s1290_s9, %s1284_s30 }
  0x2e   : > { %1116 = vmatprep.mubr.msk.f32.mxu1 %vm336_vm0, %v310_v17  ;;  %v312_v21 = vld [vmem:[%s1488_s14 + $0x41] sm:$0xff]  ;;  %v313_v23 = vld [vmem:[%s1488_s14 + $0x51] sm:$0xff]  ;;  %p1287_p5 = pneg %p1286_p4 }
  0x2f   : > { %1149 = vmatmul.mubr.msk.f32.gmra.mrb[2].mxu0 %vm336_vm0, %v319_v18  ;;  %v322_v24 = vld [vmem:[%s1482_s11 + $0x60] sm:$0xff]  ;;  %v323_v26 = vld [vmem:[%s1482_s11 + $0x70] sm:$0xff]  ;;  %p1293_p8 = por %p1292_p7, %p1291_p6 }
  0x30   : > { %1117 = vmatmul.mubr.msk.f32.gmra.mrb[2].mxu1 %vm336_vm0, %v311_v19  ;;  %1151 = vmatprep.mubr.msk.f32.mxu0 %vm336_vm0, %v320_v20  ;;  %v314_v25 = vld [vmem:[%s1488_s14 + $0x61] sm:$0xff]  ;;  %v315_v27 = vld [vmem:[%s1488_s14 + $0x71] sm:$0xff] }
  0x31   : > { %1119 = vmatprep.mubr.msk.f32.mxu1 %vm336_vm0, %v312_v21  ;;  %v324_v28 = vld [vmem:[%s1482_s11 + $0x1] sm:$0xff]  ;;  %v325_v30 = vld [vmem:[%s1482_s11 + $0x11] sm:$0xff]  ;;  %p1294_p10 = pnand %p1293_p8, %p1287_p5 }
  0x32   : > { %v300_v29 = vld [vmem:[%s1488_s14] sm:$0xff]  ;;  %v301_v31 = vld [vmem:[%s1488_s14 + $0x10] sm:$0xff] }
  0x33   : > { %1152 = vmatmul.mubr.msk.f32.gmra.mrb[4].mxu0 %vm336_vm0, %v321_v22  ;;  %v326_v32 = vld [vmem:[%s1482_s11 + $0x21] sm:$0xff]  ;;  %v327_v34 = vld [vmem:[%s1482_s11 + $0x31] sm:$0xff] }
  0x34   : > { %1120 = vmatmul.mubr.msk.f32.gmra.mrb[4].mxu1 %vm336_vm0, %v313_v23  ;;  %1154 = vmatprep.mubr.msk.f32.mxu0 %vm336_vm0, %v322_v24  ;;  %v302_v33 = vld [vmem:[%s1488_s14 + $0x20] sm:$0xff]  ;;  %v303_v35 = vld [vmem:[%s1488_s14 + $0x30] sm:$0xff] }
  0x35   : > { %1122 = vmatprep.mubr.msk.f32.mxu1 %vm336_vm0, %v314_v25  ;;  %v328_v36 = vld [vmem:[%s1482_s11 + $0x41] sm:$0xff]  ;;  %v329_v38 = vld [vmem:[%s1482_s11 + $0x51] sm:$0xff] }
  0x36   : > { %v304_v37 = vld [vmem:[%s1488_s14 + $0x40] sm:$0xff]  ;;  %v305_v39 = vld [vmem:[%s1488_s14 + $0x50] sm:$0xff] }
  0x37   : > { %1155 = vmatmul.mubr.msk.f32.gmra.mrb[6].mxu0 %vm336_vm0, %v323_v26  ;;  %v330_v40 = vld [vmem:[%s1482_s11 + $0x61] sm:$0xff]  ;;  %v331_v42 = vld [vmem:[%s1482_s11 + $0x71] sm:$0xff] }
  0x38   : > { %1123 = vmatmul.mubr.msk.f32.gmra.mrb[6].mxu1 %vm336_vm0, %v315_v27  ;;  %1161 = vmatprep.mubr.msk.f32.mxu0 %vm336_vm0, %v324_v28  ;;  %v306_v41 = vld [vmem:[%s1488_s14 + $0x60] sm:$0xff]  ;;  %v307_v43 = vld [vmem:[%s1488_s14 + $0x70] sm:$0xff] }
  0x39   : > { %1129 = vmatprep.mubr.msk.f32.mxu1 %vm336_vm0, %v300_v29 }
  0x3b   : > { %1162 = vmatmul.mubr.msk.f32.vlgmr.msra.gmra.mrb[0].mxu0 %vm336_vm0, %v325_v30 }
  0x3c   : > { %1130 = vmatmul.mubr.msk.f32.vlgmr.msra.gmra.mrb[0].mxu1 %vm336_vm0, %v301_v31  ;;  %1164 = vmatprep.mubr.msk.f32.mxu0 %vm336_vm0, %v326_v32 }
  0x3d   : > { %1132 = vmatprep.mubr.msk.f32.mxu1 %vm336_vm0, %v302_v33 }
  0x3f   : > { %1165 = vmatmul.mubr.msk.f32.gmra.mrb[2].mxu0 %vm336_vm0, %v327_v34 }
  0x40   : > { %1133 = vmatmul.mubr.msk.f32.gmra.mrb[2].mxu1 %vm336_vm0, %v303_v35  ;;  %1167 = vmatprep.mubr.msk.f32.mxu0 %vm336_vm0, %v328_v36 }
  0x41   : > { %1135 = vmatprep.mubr.msk.f32.mxu1 %vm336_vm0, %v304_v37 }
  0x43   : > { %1168 = vmatmul.mubr.msk.f32.gmra.mrb[4].mxu0 %vm336_vm0, %v329_v38 }
  0x44   : > { %1136 = vmatmul.mubr.msk.f32.gmra.mrb[4].mxu1 %vm336_vm0, %v305_v39  ;;  %1170 = vmatprep.mubr.msk.f32.mxu0 %vm336_vm0, %v330_v40 }
  0x45   : > { %1138 = vmatprep.mubr.msk.f32.mxu1 %vm336_vm0, %v306_v41 }
  0x47   : > { %1171 = vmatmul.mubr.msk.f32.gmra.mrb[6].mxu0 %vm336_vm0, %v331_v42 }
  0x48   : > { %1139 = vmatmul.mubr.msk.f32.gmra.mrb[6].mxu1 %vm336_vm0, %v307_v43 }
 0x10e   : > { %v1163_v44 = vpop.f32.mrb[0].mxu0 }
 0x10f   : > { %v1131_v45 = vpop.f32.mrb[0].mxu1  ;;  %v826_v46 = vpop.f32.mrb[1].mxu0 }
 0x110   : > { %v1189_v47 = vadd.f32 %v1163_v44, %v1131_v45  ;;  %v556_v48 = vpop.f32.mrb[1].mxu1 }
 0x111   : > { %v1190_v49 = vadd.f32 %v826_v46, %v556_v48 }
 0x112   : > { %874 = vst [vmem:[%s262_s17 + $0x8] sm:$0xff] %v1189_v47  ;;  %v1166_v50 = vpop.f32.mrb[2].mxu0 }
 0x113   : > { %873 = vst [vmem:[%s262_s17] sm:$0xff] %v1190_v49  ;;  %v1134_v51 = vpop.f32.mrb[2].mxu1  ;;  %v836_v52 = vpop.f32.mrb[3].mxu0 }
 0x114   : > { %v1191_v53 = vadd.f32 %v1166_v50, %v1134_v51  ;;  %v566_v54 = vpop.f32.mrb[3].mxu1 }
 0x115   : > { %v1192_v55 = vadd.f32 %v836_v52, %v566_v54 }
 0x116   : > { %876 = vst [vmem:[%s262_s17 + $0x18] sm:$0xff] %v1191_v53  ;;  %v1169_v56 = vpop.f32.mrb[4].mxu0 }
 0x117   : > { %875 = vst [vmem:[%s262_s17 + $0x10] sm:$0xff] %v1192_v55  ;;  %v1137_v57 = vpop.f32.mrb[4].mxu1  ;;  %v846_v58 = vpop.f32.mrb[5].mxu0 }
 0x118   : > { %v1193_v59 = vadd.f32 %v1169_v56, %v1137_v57  ;;  %v576_v60 = vpop.f32.mrb[5].mxu1 }
 0x119   : > { %v1194_v61 = vadd.f32 %v846_v58, %v576_v60 }
 0x11a   : > { %878 = vst [vmem:[%s262_s17 + $0x28] sm:$0xff] %v1193_v59  ;;  %v1172_v62 = vpop.f32.mrb[6].mxu0 }
 0x11b   : > { %877 = vst [vmem:[%s262_s17 + $0x20] sm:$0xff] %v1194_v61  ;;  %v1140_v63 = vpop.f32.mrb[6].mxu1  ;;  %v856_v0 = vpop.f32.mrb[7].mxu0 }
 0x11c   : > { %v1195_v1 = vadd.f32 %v1172_v62, %v1140_v63  ;;  %v586_v2 = vpop.f32.mrb[7].mxu1 }
 0x11d   : > { %v1196_v3 = vadd.f32 %v856_v0, %v586_v2 }
 0x11e   : > { %880 = vst [vmem:[%s262_s17 + $0x38] sm:$0xff] %v1195_v1 }
 0x11f   : > { %879 = vst [vmem:[%s262_s17 + $0x30] sm:$0xff] %v1196_v3 }
 0x120   : > { %1297 = shalt.err (!%p1294_p10)
}
 0x121   : > { %s1298_s10 = scalar_lea.hbm %s1560_s28, 1024  ;;  %s1302_s13 = scalar_lea.hbm %s1616_s4, 2048 }
 0x122   : > { %p1299_p11 = scmp.ne.s32.totalorder %s1560_s28, %s1298_s10  ;;  %p1303_p1 = scmp.lt.u32.totalorder %s1560_s28, %s1616_s4 }
 0x123   : > { %p1304_p2 = scmp.lt.u32.totalorder %s1302_s13, %s1298_s10  ;;  %p1306_p4 = scmp.lt.u32.totalorder %s1298_s10, %s1560_s28 }
 0x124   : > { %p1300_p12 = pnand %p1299_p11, %p1438_p9 }
 0x125   : > { %p1305_p3 = por %p1304_p2, %p1303_p1 }
 0x126   : > { %p1301_p0 = pneg %p1300_p12 }
 0x127   : > { %p1307_p5 = por %p1306_p4, %p1305_p3 }
 0x129   : > { %p1308_p6 = pnand %p1307_p5, %p1301_p0 }
 0x12b   : > { %1311 = shalt.err (!%p1308_p6)
}
 0x12c   : > { %s1368_s16 = smov 128   ;;  %s1369_s17 = smov 8  }
 0x12d   : > { %1214 = dma.vmem_to_hbm [thread:$0]  (%p1438_p9), %s1562_s19, 1024, %s1560_s28, %s1566_s22, %s1368_s16, %s1368_s16, %s1369_s17  }
 0x12e PF: > { %p1220_p7 = scmp.ge.s32.totalorder %s1364_s24, 2  ;;  %s913_s18 = sand.u32 1, %s1344_s20  }
 0x12f   : > { %s914_s25 = scalar_lea.sflag [#allocation5], %s913_s18 }
 0x130   : > { %p1217_p8 = pnand %p1220_p7, %p1445_p13 }
 0x132   : > { %1339 = dma.done.wait (!%p1217_p8), %s914_s25, 1024  }
 0x133   : > { %1341 = vsyncadd (!%p1217_p8), %s914_s25, 4294966272  ;;  %s23_s24 = sadd.s32 1, %s1364_s24   ;;  %s1619_s20 = smov %s1348_s21 }
 0x134   : > { %p20_p10 = scmp.ge.s32.totalorder %s23_s24, 4   ;;  %s1620_s21 = smov %s1352_s0 }
 0x135   : > { %s1621_s0 = smov %s1451_s6  ;;  %s1622_s22 = smov %s1360_s23 }
 0x136   : > { %s1623_s23 = smov %s1625_s27  ;;  %22 = sbr.rel (!%p20_p10) target bundleno = 19 (0x13), region = 73 }
 0x13d   :  { %919 = vsyncpa [#allocation5], 1 }
 0x13e   :  { %921 = vsyncpa [#allocation5 + $0x1], 1 }

</bundles_post_ra>
